<compile_context>
chip_gen: v7x
topology: tpu7x:2x2x1
jax: 0.10.0
libtpu: 0.0.40
codegen_flags: <defaults>
</compile_context>

<pallas_src>
import functools

import jax
import jax.numpy as jnp
from jax.experimental import pallas as pl
from jax.experimental.pallas import tpu as pltpu

EPS = 1e-6


def _layernorm_kernel(params_ref, x_ref, o_ref):
    # params_ref: SMEM (2,) f32 -> [alpha, bias]
    # x_ref / o_ref: VMEM (row_tile, d) tile of rows.
    x = x_ref[...].astype(jnp.float32)
    d = x.shape[-1]

    # Two per-row XLU reductions; the 1/d and 1/(d-1) scalings are folded into
    # the reduced (TR, 1) vectors instead of full-tile broadcasts.
    mean = jnp.sum(x, axis=-1, keepdims=True) * (1.0 / d)
    centered = x - mean
    var = jnp.sum(centered * centered, axis=-1, keepdims=True) * (1.0 / (d - 1))
    std = jnp.sqrt(var)

    # Per-row reciprocal on the EUP (approx) + one Newton step on the tiny
    # (TR, 1) vector to recover f32 accuracy; fold alpha into the scale so the
    # full-tile hot path is a single broadcast multiply-add per element.
    denom = std + EPS
    inv = pl.reciprocal(denom, approx=True)
    inv = inv * (2.0 - denom * inv)

    scale = params_ref[0] * inv                      # (TR, 1)
    o_ref[...] = (centered * scale + params_ref[1]).astype(o_ref.dtype)


def _tpu_vmem_capacity_bytes():
    # Generation-aware VMEM capacity (per TensorCore). Fall back to the most
    # conservative known value (v7x: 64 MiB/TC) if the query is unavailable.
    try:
        cap = int(pltpu.get_tpu_info().vmem_capacity_bytes)
        if cap > 0:
            return cap
    except Exception:
        pass
    return 64 * 1024 * 1024


def _sublane(itemsize):
    # Rows per vreg sublane group: f32 -> 8, bf16 -> 16, int8/fp8 -> 32.
    return max(8, 32 // itemsize)


def _pick_row_tile(rows, d, itemsize, vmem_cap, target=1024):
    sub = _sublane(itemsize)
    # VMEM bytes held per row: double-buffered input + output tiles plus ~3
    # full-tile f32 temporaries inside the body (upcast x, centered, staging).
    per_row = 4 * d * itemsize + 12 * d
    budget = (3 * vmem_cap) // 4                     # ~0.75x of physical VMEM
    fit = max(sub, (budget // per_row) // sub * sub)
    tile = min(target, fit)

    rows_r = pl.cdiv(rows, sub) * sub                # rows rounded to sublane
    tile = min(tile, rows_r)

    # Guarantee >= 2 grid steps whenever the problem allows it so the
    # "parallel" row grid can shard across both TensorCores on v7x
    # (negligible cost elsewhere: ~0.35 us/step).
    if tile >= rows_r and rows_r >= 2 * sub:
        half = pl.cdiv(rows_r // 2, sub) * sub
        tile = min(tile, half)

    return max(sub, (tile // sub) * sub)


def _vmem_limit_bytes(row_tile, d, itemsize, vmem_cap):
    buffers = 4 * row_tile * d * itemsize            # 2x input + 2x output bufs
    f32_ws = 3 * row_tile * d * 4                    # in-kernel f32 temporaries
    need = buffers + f32_ws + (4 << 20)              # headroom
    # Floor for misc compiler scratch, cap below physical VMEM per core.
    return int(min(max(need, 16 << 20), (9 * vmem_cap) // 10))


@functools.partial(jax.jit, static_argnames=("row_tile",))
def decoder_forward(x, encoder_output, src_mask, tgt_mask, alpha, bias,
                    row_tile=None):
    """Pallas equivalent of Decoder.forward.

    x: [B, S, D]; encoder_output / src_mask / tgt_mask are accepted for
    signature parity but unused because no decoder layers are defined.
    """
    del encoder_output, src_mask, tgt_mask  # no layers supplied -> identity

    b, s, d = x.shape
    if d < 2:
        raise ValueError("d_model must be >= 2 (unbiased std divides by d-1)")

    rows = b * s
    itemsize = jnp.dtype(x.dtype).itemsize
    vmem_cap = _tpu_vmem_capacity_bytes()
    if row_tile is None:
        row_tile = _pick_row_tile(rows, d, itemsize, vmem_cap)

    # No pad / no slice: ragged boundary block (if any) is masked by Pallas.
    x2d = x.reshape(rows, d)

    params = jnp.stack(
        [jnp.asarray(alpha, jnp.float32).reshape(()),
         jnp.asarray(bias, jnp.float32).reshape(())])

    out2d = pl.pallas_call(
        _layernorm_kernel,
        out_shape=jax.ShapeDtypeStruct((rows, d), x.dtype),
        grid=(pl.cdiv(rows, row_tile),),
        in_specs=[
            pl.BlockSpec(memory_space=pltpu.SMEM),          # [alpha, bias]
            pl.BlockSpec((row_tile, d), lambda i: (i, 0)),  # row tile of x
        ],
        out_specs=pl.BlockSpec((row_tile, d), lambda i: (i, 0)),
        compiler_params=pltpu.CompilerParams(
            dimension_semantics=("parallel",),
            vmem_limit_bytes=_vmem_limit_bytes(row_tile, d, itemsize, vmem_cap),
        ),
    )(params, x2d)

    return out2d.reshape(b, s, d)


def _reference(x, alpha, bias):
    # Pure-JAX reference mirroring the PyTorch math (unbiased std, eps on std).
    mean = jnp.mean(x, axis=-1, keepdims=True)
    centered = x - mean
    var = jnp.sum(centered * centered, axis=-1, keepdims=True) / (x.shape[-1] - 1)
    std = jnp.sqrt(var)
    return alpha * centered / (std + EPS) + bias


if __name__ == "__main__":
    key = jax.random.PRNGKey(0)
    k_x, k_enc = jax.random.split(key)

    B, S, D = 2, 8, 128   # lane-dense d_model (multiple of 128)
    x = jax.random.normal(k_x, (B, S, D), dtype=jnp.float32)
    encoder_output = jax.random.normal(k_enc, (B, S, D), dtype=jnp.float32)
    src_mask = jnp.ones((B, 1, 1, S), dtype=jnp.float32)
    tgt_mask = jnp.tril(jnp.ones((S, S), dtype=jnp.float32))[None, None]

    # Deterministic parameter init matching LayerNormalization.__init__
    alpha = jnp.ones((1,), dtype=jnp.float32)
    bias = jnp.zeros((1,), dtype=jnp.float32)

    out = decoder_forward(x, encoder_output, src_mask, tgt_mask, alpha, bias)
    out = jax.block_until_ready(out)

    ref = _reference(x, alpha, bias)
    assert out.shape == (B, S, D)
    assert jnp.allclose(out, ref, atol=1e-5, rtol=1e-5), "mismatch vs reference"

    print("KERNEL_OK")
</pallas_src>

<mosaic_0001>
module attributes {stable_mosaic.version = 11 : i64} {
  func.func @_layernorm_kernel(%arg0: i32, %arg1: memref<2xf32, #tpu.memory_space<smem>>, %arg2: memref<8x128xf32, #tpu.memory_space<vmem>>, %arg3: memref<8x128xf32, #tpu.memory_space<vmem>>) attributes {dimension_semantics = [#tpu.dimension_semantics<parallel>], iteration_bounds = array<i64: 2>, scalar_prefetch = 0 : i64, scratch_operands = 0 : i64, tpu.core_type = #tpu.core_type<tc>, window_params = [{transform_indices = @transform_0, window_bounds = array<i64: 2>}, {transform_indices = @transform_1, window_bounds = array<i64: 8, 128>}, {transform_indices = @transform_2, window_bounds = array<i64: 8, 128>}]} {
    %c0 = arith.constant 0 : index
    %c0_0 = arith.constant 0 : index
    %0 = vector.load %arg2[%c0, %c0_0] : memref<8x128xf32, #tpu.memory_space<vmem>>, vector<8x128xf32>
    %cst = arith.constant dense<0.000000e+00> : vector<8xf32>
    %1 = vector.multi_reduction <add>, %0, %cst [1] : vector<8x128xf32> to vector<8xf32>
    %2 = vector.shape_cast %1 : vector<8xf32> to vector<8x1xf32>
    %cst_1 = arith.constant 7.812500e-03 : f32
    %3 = vector.broadcast %cst_1 : f32 to vector<8x1xf32>
    %4 = arith.mulf %2, %3 : vector<8x1xf32>
    %5 = vector.broadcast %4 : vector<8x1xf32> to vector<8x128xf32>
    %6 = arith.subf %0, %5 : vector<8x128xf32>
    %7 = arith.mulf %6, %6 : vector<8x128xf32>
    %cst_2 = arith.constant dense<0.000000e+00> : vector<8xf32>
    %8 = vector.multi_reduction <add>, %7, %cst_2 [1] : vector<8x128xf32> to vector<8xf32>
    %9 = vector.shape_cast %8 : vector<8xf32> to vector<8x1xf32>
    %cst_3 = arith.constant 0.00787401571 : f32
    %10 = vector.broadcast %cst_3 : f32 to vector<8x1xf32>
    %11 = arith.mulf %9, %10 : vector<8x1xf32>
    %12 = math.sqrt %11 : vector<8x1xf32>
    %cst_4 = arith.constant 9.99999997E-7 : f32
    %13 = vector.broadcast %cst_4 : f32 to vector<8x1xf32>
    %14 = arith.addf %12, %13 : vector<8x1xf32>
    %15 = tpu.reciprocal %14 {approx = true} : vector<8x1xf32> -> vector<8x1xf32>
    %16 = arith.mulf %14, %15 : vector<8x1xf32>
    %cst_5 = arith.constant 2.000000e+00 : f32
    %17 = vector.broadcast %cst_5 : f32 to vector<8x1xf32>
    %18 = arith.subf %17, %16 : vector<8x1xf32>
    %19 = arith.mulf %15, %18 : vector<8x1xf32>
    %c0_6 = arith.constant 0 : index
    %20 = memref.load %arg1[%c0_6] : memref<2xf32, #tpu.memory_space<smem>>
    %21 = vector.broadcast %20 : f32 to vector<8x1xf32>
    %22 = arith.mulf %21, %19 : vector<8x1xf32>
    %23 = vector.broadcast %22 : vector<8x1xf32> to vector<8x128xf32>
    %24 = arith.mulf %6, %23 : vector<8x128xf32>
    %c1 = arith.constant 1 : index
    %25 = memref.load %arg1[%c1] : memref<2xf32, #tpu.memory_space<smem>>
    %26 = vector.broadcast %25 : f32 to vector<8x128xf32>
    %27 = arith.addf %24, %26 : vector<8x128xf32>
    %c0_7 = arith.constant 0 : index
    %c0_8 = arith.constant 0 : index
    %28 = vector.load %arg3[%c0_7, %c0_8] : memref<8x128xf32, #tpu.memory_space<vmem>>, vector<8x128xf32>
    tpu.vector_store %arg3[%c0_7, %c0_8], %27 {strides = array<i32>} : memref<8x128xf32, #tpu.memory_space<vmem>>, vector<8x128xf32>,
    return
  }
  func.func @transform_0(%arg0: i32) -> i32 {
    %c0_i32 = arith.constant 0 : i32
    %c0_i32_0 = arith.constant 0 : i32
    return %c0_i32 : i32
  }
  func.func @transform_1(%arg0: i32) -> (i32, i32) {
    %c0_i32 = arith.constant 0 : i32
    %c0_i32_0 = arith.constant 0 : i32
    return %arg0, %c0_i32 : i32, i32
  }
  func.func @transform_2(%arg0: i32) -> (i32, i32) {
    %c0_i32 = arith.constant 0 : i32
    %c0_i32_0 = arith.constant 0 : i32
    return %arg0, %c0_i32 : i32, i32
  }
}

</mosaic_0001>

<bundles_post_ra>
// kernel: decoder_forward.1
= control target key start
LH: loop header
LB: loop body
LE: loop exit
PB: predicated region body
PF: predicated region fallthrough
CT: control target
= control target key end

     0   :  { %7 = vsyncpa [#allocation5], 0  ;;  %s705_s0 = inlined_call_operand.vmem [shape: f32[2], index: 0, kind: input, shape index: {}]   ;;  %s706_s1 = inlined_call_operand.hbm [shape: f32[16,128], index: 1, kind: input, shape index: {}]   ;;  %s707_s2 = inlined_call_operand.hbm [shape: f32[16,128], index: 2, kind: output, shape index: {}]  }
   0x1   :  { %8 = vsyncpa [#allocation3], 0 }
   0x2   :  { %10 = vsyncpa [#allocation3 + $0x1], 0 }
   0x3   :  { %11 = vsyncpa [#allocation4], 0 }
   0x4   :  { %13 = vsyncpa [#allocation4 + $0x1], 0  ;;  %s509_s9 = smov 0   ;;  %s511_s10 = smov 0  }
   0x5   :  { %s513_s11 = smov 0   ;;  %s515_s12 = smov 0  }
   0x6 LB: > { %s530_s13 = sadd.s32 4294967295, %s489_s12   ;;  %s298_s14 = sadd.s32 4294967294, %s489_s12   ;;  %s489_s12 = sphi %s515_s12, %s728_s12   ;;  %s485_s11 = sphi %s513_s11, %s727_s11   ;;  %s481_s10 = sphi %s511_s10, %s726_s10   ;;  %s477_s9 = sphi %s509_s9, %s725_s9  }
   0x7   : > { %p60_p0 = scmp.ne.s32.totalorder %s481_s10, %s477_s9  ;;  %p708_p1 = scmp.eq.s32.totalorder %s530_s13, 0 }
   0x8   : > { %p90_p3 = scmp.eq.s32.totalorder %s298_s14, 1  ;;  %p299_p5 = scmp.ge.s32.totalorder %s489_s12, 1 }
   0x9   : > { %p539_p4 = por %p708_p1, %p60_p0  ;;  %p97_p7 = scmp.lt.s32.totalorder %s489_s12, 3 }
   0xa   : > { %p544_p6 = por %p90_p3, %p60_p0  ;;  %s110_s19 = sshll.u32 %s705_s0, 4  ;;  %s111_s19 = int_to_ptr.vmem [resolvable:$true] %s110_s19 }
   0xb   : > { %s711_s15 = scalar_select %p539_p4, 1, 0 }
   0xc   : > { %s712_s16 = scalar_select %p544_p6, 1, 0 }
   0xd   : > { %p552_p8 = pnand %p299_p5, %p97_p7  ;;  %s560_s21 = sadd.s32 1, %s489_s12  }
   0xe   : > { %s44_s23 = ssub.s32 %s489_s12, %s560_s21  ;;  %s47_s25 = sadd.s32 1, %s485_s11 }
   0xf   : > { %p321_p10 = pneg %p552_p8  ;;  %p570_p12 = scmp.eq.s32.totalorder %s44_s23, 0 }
  0x10   : > { %p54_p13 = scmp.ne.s32.totalorder %s485_s11, %s481_s10  ;;  %s374_s26 = scalar_lea.vmem %s111_s19, 16 }
  0x11   : > { %p564_p11 = pnand %p321_p10, %p708_p1  ;;  %p375_p0 = scmp.ne.s32.totalorder %s111_s19, %s374_s26 }
  0x12   : > { %p382_p9 = scmp.lt.s32.totalorder %s111_s19, %s111_s19  ;;  %p383_p2 = scmp.lt.s32.totalorder %s374_s26, %s374_s26 }
  0x13   : > { %p376_p3 = pneg %p564_p11 }
  0x14   : > { %p384_p10 = por %p383_p2, %p382_p9 }
  0x15   : > { %p377_p5 = pnand %p376_p3, %p375_p0 }
  0x17   : > { %p378_p7 = pneg %p377_p5 }
  0x19   : > { %p385_p1 = pnand %p384_p10, %p378_p7 }
  0x1b   : > { %388 = shalt.err (!%p385_p1)
}
  0x1c   : > { %s491_s27 = smov [#allocation2]   ;;  %p55_p2 = scmp.eq.s32.totalorder %s489_s12, 0 }
  0x1d   : > { %324 = dma.vmem_to_smem (!%p564_p11), %s111_s19, 16, %s491_s27, [#allocation5]  }
  0x1e   : > { %s584_s28 = scalar_select %p570_p12, %s485_s11, %s47_s25  }
  0x1f   : > { %p716_p1 = scmp.eq.s32.totalorder %s530_s13, 1  ;;  %p334_p0 = scmp.lt.s32.totalorder %s489_s12, 2 }
  0x20   : > { %s121_s30 = sand.u32 1, %s485_s11   ;;  %p56_p3 = por %p55_p2, %p54_p13 }
  0x21   : > { %p592_p9 = por %p716_p1, %p54_p13  ;;  %s302_s3 = sshll.u32 %s121_s30, 3 }
  0x22   : > { %s303_s4 = sshll.u32 %s489_s12, 7  ;;  %s125_s8 = scalar_lea.vmem [#allocation6], %s302_s3 }
  0x23   : > { %s717_s29 = scalar_select %p592_p9, 1, 0 }
  0x24   : > { %s605_s7 = scalar_lea.hbm %s706_s1, %s303_s4  ;;  %s132_s14 = sshll.u32 %s125_s8, 4  ;;  %s611_s14 = int_to_ptr.vmem [resolvable:$true] %s132_s14 }
  0x25   : > { %p607_p11 = pnand %p334_p0, %p56_p3  ;;  %s122_s18 = scalar_lea.sflag [#allocation3], %s121_s30 }
  0x26   : > { %s389_s19 = scalar_lea.hbm %s605_s7, 128  ;;  %s394_s24 = scalar_lea.hbm %s706_s1, 256 }
  0x27   : > { %p390_p12 = scmp.ne.s32.totalorder %s605_s7, %s389_s19  ;;  %p391_p13 = pneg %p607_p11 }
  0x28   : > { %p395_p10 = scmp.lt.u32.totalorder %s605_s7, %s706_s1  ;;  %p396_p2 = scmp.lt.u32.totalorder %s394_s24, %s389_s19 }
  0x29   : > { %p392_p5 = pnand %p391_p13, %p390_p12  ;;  %p398_p0 = scmp.lt.u32.totalorder %s389_s19, %s605_s7 }
  0x2a   : > { %p397_p1 = por %p396_p2, %p395_p10 }
  0x2b   : > { %p393_p7 = pneg %p392_p5 }
  0x2c   : > { %p399_p3 = por %p398_p0, %p397_p1 }
  0x2e   : > { %p400_p6 = pnand %p399_p3, %p393_p7 }
  0x30   : > { %403 = shalt.err (!%p400_p6)
}
  0x31   : > { %s404_s27 = scalar_lea.vmem %s611_s14, 128  ;;  %s492_s30 = smov [#allocation6]  }
  0x32   : > { %p405_p12 = scmp.ne.s32.totalorder %s611_s14, %s404_s27  ;;  %s409_s3 = sshll.u32 %s492_s30, 4  ;;  %s410_s3 = int_to_ptr.vmem [resolvable:$false] %s409_s3 }
  0x33   : > { %s411_s4 = scalar_lea.vmem %s410_s3, 256  ;;  %p412_p4 = scmp.lt.s32.totalorder %s611_s14, %s410_s3 }
  0x34   : > { %p407_p5 = pnand %p405_p12, %p391_p13  ;;  %p413_p10 = scmp.lt.s32.totalorder %s411_s4, %s404_s27 }
  0x36   : > { %p408_p9 = pneg %p407_p5  ;;  %p414_p2 = por %p413_p10, %p412_p4 }
  0x38   : > { %p415_p1 = pnand %p414_p2, %p408_p9 }
  0x3a   : > { %418 = shalt.err (!%p415_p1)
}
  0x3b   : > { %328 = dma.hbm_to_vmem [thread:$0]  (!%p607_p11), %s605_s7, 128, %s611_s14, %s122_s18  }
  0x3c   : > { %141 = sbr.rel (%p552_p8) target bundleno = 421 (0x1a5), region = 28  ;;  %p719_p6 = scmp.eq.s32.totalorder (!%p552_p8), %s530_s13, 0 }
  0x43   : > { %464 = dma.done.wait (%p719_p6), [#allocation5], 16   ;;  %p720_p13 = pmov %p719_p6 }
  0x44   : > { %s645_s5 = sand.u32 1, %s481_s10   ;;  %p721_p4 = scmp.ne.s32.totalorder %s711_s15, 0 }
  0x45   : > { %466 = vsyncadd (%p720_p13), [#allocation5], 4294967280  ;;  %s306_s6 = sshll.u32 %s645_s5, 3  ;;  %s148_s8 = scalar_lea.sflag [#allocation3], %s645_s5 }
  0x46   : > { %s151_s7 = scalar_lea.vmem [#allocation6], %s306_s6 }
  0x47   : > { %468 = dma.done.wait (%p721_p4), %s148_s8, 128  }
  0x48   : > { %470 = vsyncadd (%p721_p4), %s148_s8, 4294967168 }
  0x49   : > { %156 = sfence }
  0x4a   : > { %v173_v0 = vld [vmem:[%s151_s7] sm:$0xff]  ;;  %s194_s15 = sld [smem:[#allocation2]]  ;;  %s308_s20 = sld [smem:[#allocation2 + $0x1]] }
  0x4b   : > { %174 = vadd.xlane.f32.xlu0 %v173_v0  ;;  %s310_s14 = sshll.u32 %s530_s13, 7  ;;  %s172_s17 = scalar_lea.vmem [#allocation7], %s306_s6 }
  0x4c   : > { %s216_s18 = sshll.u32 %s172_s17, 4  ;;  %s661_s23 = scalar_lea.hbm %s707_s2, %s310_s14  ;;  %s663_s18 = int_to_ptr.vmem [resolvable:$true] %s216_s18 }
  0x4d   : > { %s203_s24 = scalar_lea.sflag [#allocation4], %s645_s5  ;;  %s419_s25 = scalar_lea.vmem %s663_s18, 128 }
  0x4e   : > { %p420_p8 = scmp.ne.s32.totalorder %s663_s18, %s419_s25  ;;  %p722_p9 = scmp.ne.s32.totalorder %s717_s29, 0 }
  0x4f   : > { %s493_s13 = smov [#allocation7]  }
  0x50   : > { %v195_v16 = vstv %s194_s15  ;;  %v199_v19 = vstv %s308_s20  ;;  %p421_p11 = pnand %p420_p8, %p722_p9  ;;  %s423_s26 = sshll.u32 %s493_s13, 4  ;;  %s424_s26 = int_to_ptr.vmem [resolvable:$false] %s423_s26 }
  0x51   : > { %s425_s27 = scalar_lea.vmem %s424_s26, 256  ;;  %p426_p0 = scmp.lt.s32.totalorder %s663_s18, %s424_s26 }
  0x52   : > { %p422_p7 = pneg %p421_p11  ;;  %p427_p3 = scmp.lt.s32.totalorder %s425_s27, %s419_s25 }
  0x54   : > { %p428_p12 = por %p427_p3, %p426_p0 }
  0x56   : > { %p429_p5 = pnand %p428_p12, %p422_p7 }
  0xd8   : > { %v175_v1 = vpop.xlane.xlu0 %174 }
  0xd9   : > { %v176_v2 = vmul.f32 0.0078125, %v175_v1 }
  0xdb   : > { %v177_v3 = vsub.f32 %v173_v0, %v176_v2 }
  0xdd   : > { %v178_v4 = vmul.f32 %v177_v3, %v177_v3 }
  0xdf   : > { %179 = vadd.xlane.f32.xlu0 %v178_v4 }
 0x16c   : > { %v180_v5 = vpop.xlane.xlu0 %179 }
 0x16d   : > { %v181_v6 = vmul.f32 0.007874016, %v180_v5 }
 0x16f   : > { %370 = vrsqrt.f32 %v181_v6  ;;  %vm184_vm0 = vcmp.eq.f32.partialorder %v181_v6, inf  ;;  %v187_v9 = vand.u32 2147483648, %v181_v6  ;;  %vm186_vm1 = vcmp.eq.f32.partialorder %v181_v6, 0.0 }
 0x179   : > { %v371_v7 = vpop.eup %370 }
 0x17a   : > { %v183_v8 = vmul.f32 %v371_v7, %v181_v6 }
 0x17c   : > { %v185_v10 = vsel %vm184_vm0, %v181_v6, %v183_v8 }
 0x17d   : > { %v188_v11 = vsel %vm186_vm1, %v187_v9, %v185_v10 }
 0x17e   : > { %v189_v12 = vadd.f32 1e-06, %v188_v11 }
 0x180   : > { %372 = vrcp.f32 %v189_v12 }
 0x18a   : > { %v373_v13 = vpop.eup %372 }
 0x18b   : > { %v191_v14 = vmul.f32 %v373_v13, %v189_v12 }
 0x18d   : > { %v192_v15 = vsub.f32 2.0, %v191_v14 }
 0x18f   : > { %v193_v17 = vmul.f32 %v373_v13, %v192_v15 }
 0x191   : > { %v196_v18 = vmul.f32 %v195_v16, %v193_v17 }
 0x193   : > { %v197_v20 = vmul.f32 %v196_v18, %v177_v3 }
 0x195   : > { %v200_v21 = vadd.f32 %v199_v19, %v197_v20 }
 0x197   : > { %201 = vst [vmem:[%s172_s17] sm:$0xff] %v200_v21 }
 0x198   : > { %432 = shalt.err (!%p429_p5)
}
 0x199   : > { %s433_s30 = scalar_lea.hbm %s661_s23, 128  ;;  %s437_s5 = scalar_lea.hbm %s707_s2, 256 }
 0x19a   : > { %p434_p10 = scmp.ne.s32.totalorder %s661_s23, %s433_s30  ;;  %p438_p6 = scmp.lt.u32.totalorder %s661_s23, %s707_s2 }
 0x19b   : > { %p439_p13 = scmp.lt.u32.totalorder %s437_s5, %s433_s30  ;;  %p441_p8 = scmp.lt.u32.totalorder %s433_s30, %s661_s23 }
 0x19c   : > { %p435_p2 = pnand %p434_p10, %p722_p9 }
 0x19d   : > { %p440_p4 = por %p439_p13, %p438_p6 }
 0x19e   : > { %p436_p1 = pneg %p435_p2 }
 0x19f   : > { %p442_p11 = por %p441_p8, %p440_p4 }
 0x1a1   : > { %p443_p7 = pnand %p442_p11, %p436_p1 }
 0x1a3   : > { %446 = shalt.err (!%p443_p7)
}
 0x1a4   : > { %319 = dma.vmem_to_hbm [thread:$0]  (%p722_p9), %s663_s18, 128, %s661_s23, %s203_s24  }
 0x1a5 PF: > { %s228_s7 = sand.u32 1, %s477_s9   ;;  %p723_p0 = scmp.ne.s32.totalorder %s712_s16, 0 }
 0x1a6   : > { %p724_p3 = scmp.ge.s32.totalorder %s489_s12, 2  ;;  %s229_s15 = scalar_lea.sflag [#allocation4], %s228_s7 }
 0x1a8   : > { %p330_p12 = pnand %p724_p3, %p723_p0 }
 0x1aa   : > { %472 = dma.done.wait (!%p330_p12), %s229_s15, 128  }
 0x1ab   : > { %474 = vsyncadd (!%p330_p12), %s229_s15, 4294967168  ;;  %p16_p5 = scmp.ge.s32.totalorder %s560_s21, 4   ;;  %s725_s9 = smov %s481_s10 }
 0x1ac   : > { %s726_s10 = smov %s485_s11  ;;  %s727_s11 = smov %s584_s28 }
 0x1ad   : > { %s728_s12 = smov %s560_s21  ;;  %18 = sbr.rel (!%p16_p5) target bundleno = 6 (0x6), region = 78 }
 0x1b4   :  { %234 = vsyncpa [#allocation3], 1 }
 0x1b5   :  { %236 = vsyncpa [#allocation3 + $0x1], 1 }
 0x1b6   :  { %237 = vsyncpa [#allocation4], 1 }
 0x1b7   :  { %239 = vsyncpa [#allocation4 + $0x1], 1 }
 0x1b8   :  { %240 = vsyncpa [#allocation5], 1 }
 0x1b9   :  { %242 = vsyncpa [#allocation5 + $0x1], 1 }

</bundles_post_ra>
